<compile_context>
chip_gen: v5e
topology: v5e:2x2
jax: 0.10.0
libtpu: 0.0.40
codegen_flags: <defaults>
</compile_context>

<pallas_src>
import jax
import jax.numpy as jnp
from jax import lax
from jax.experimental import pallas as pl
from jax.experimental.pallas import tpu as pltpu

_MAX_TB = 2048  # batch tile cap: multiple of 128 (lane-dense (O, tb) output stores)


def _linear_softmax_kernel(x_ref, w_ref, o_ref):
    # x_ref: (tb, V) f32   -- one batch tile (cast to bf16 here, not in the wrapper)
    # w_ref: (O,  V) bf16  -- VMEM-resident weight (single-buffered, constant index map)
    # o_ref: (O, tb) f32   -- transposed output tile, batch on the lane axis
    xb = x_ref[...].astype(jnp.bfloat16)

    # h[o, b] = sum_v W[o, v] * x[b, v]  -> (O, tb), f32 accumulation on the MXU.
    h = lax.dot_general(
        w_ref[...], xb,
        dimension_numbers=(((1,), (1,)), ((), ())),
        preferred_element_type=jnp.float32,
    )

    # Numerically-stable softmax over the O axis (== PyTorch Softmax(dim=1)
    # after the wrapper-side transpose back to (B, O)).  Kept in f32 (v5e has
    # no bf16 VPU/EUP); exact divide so rows sum to 1 up to f32 rounding.
    m = jnp.max(h, axis=0, keepdims=True)
    e = jnp.exp(h - m)
    denom = jnp.sum(e, axis=0, keepdims=True)
    o_ref[...] = (e / denom).astype(o_ref.dtype)


def prepare_weight(weight):
    """One-time prep (outside the per-call forward): PyTorch (O, V) nn.Linear
    weight -> bf16.  No transpose / lane padding needed in the transposed-output
    layout."""
    return weight.astype(jnp.bfloat16)


def neural_net_forward(x, w_bf16, *, tb=None):
    """x: (B, V) f32; w_bf16: (O, V) bf16 from prepare_weight(). Returns (B, O) f32."""
    B, V = x.shape
    O = w_bf16.shape[0]

    if tb is None:
        # Whole batch in one grid step when it fits; otherwise 2048-row tiles
        # (multiple of 8 for the x sublane dim and of 128 for the output lane dim).
        tb = B if B <= _MAX_TB else _MAX_TB
    grid = (pl.cdiv(B, tb),)

    # VMEM budget: double-buffered x/out tiles + resident weight, 2x headroom,
    # floor 4 MiB, capped at 32 MiB (safe on v5e/v6e and within v7x's 64 MiB).
    x_bytes = 2 * tb * V * 4          # f32, double-buffered
    w_bytes = O * V * 2               # bf16, single-buffered
    o_bytes = 2 * 8 * tb * 4          # f32, O padded to 8 sublanes, double-buffered
    vmem_limit = int(min(max(2 * (x_bytes + w_bytes + o_bytes), 4 << 20), 32 << 20))

    out_t = pl.pallas_call(
        _linear_softmax_kernel,
        out_shape=jax.ShapeDtypeStruct((O, B), jnp.float32),
        grid=grid,
        in_specs=[
            # Batch-tiled activations (f32 straight from HBM; cast happens in-kernel).
            pl.BlockSpec((tb, V), lambda i: (i, 0)),
            # Weight: constant index map -> resident across the grid; a second
            # pipeline buffer would be pure VMEM waste, so single-buffer it.
            pl.BlockSpec((O, V), lambda i: (0, 0), pipeline_mode=pl.Buffered(1)),
        ],
        out_specs=pl.BlockSpec((O, tb), lambda i: (0, i)),
        compiler_params=pltpu.CompilerParams(
            # Batch steps are independent; on v7x with >=2 grid steps this can
            # also be tried as pltpu.CORE_PARALLEL to engage the second TC.
            dimension_semantics=("parallel",),
            vmem_limit_bytes=vmem_limit,
        ),
    )(x, w_bf16)

    # Tiny XLA transpose back to the PyTorch (B, O) layout (16B read + 16B
    # write per row vs. the old 512B padded writeback + slice).
    return out_t.T


if __name__ == "__main__":
    # Small shapes implied by the module: vector_size features -> output_size=4 logits.
    batch = 32
    vector_size = 32
    output_size = 4

    key = jax.random.PRNGKey(0)
    kx, kw = jax.random.split(key)

    x = jax.random.normal(kx, (batch, vector_size), dtype=jnp.float32)
    # PyTorch nn.Linear(vector_size, output_size, bias=False) weight shape: (O, V)
    weight = jax.random.normal(kw, (output_size, vector_size), dtype=jnp.float32) * 0.1

    w_bf16 = prepare_weight(weight)            # one-time, outside the forward
    out = neural_net_forward(x, w_bf16)        # default tile: whole batch, 1 grid step
    out = jax.block_until_ready(out)

    # Reference: softmax(x @ W.T, dim=1) in f32.
    ref = jax.nn.softmax(x @ weight.T, axis=1)

    assert out.shape == (batch, output_size)
    assert bool(jnp.allclose(jnp.sum(out, axis=1), 1.0, atol=1e-3))  # exact divide -> ~1
    assert bool(jnp.allclose(out, ref, atol=2e-2))                   # bf16 weight tolerance

    print("KERNEL_OK")
</pallas_src>

<mosaic_0001>
module attributes {stable_mosaic.version = 11 : i64} {
  func.func @_linear_softmax_kernel(%arg0: i32, %arg1: memref<32x32xf32, #tpu.memory_space<vmem>>, %arg2: memref<4x32xbf16, #tpu.memory_space<vmem>>, %arg3: memref<4x32xf32, #tpu.memory_space<vmem>>) attributes {dimension_semantics = [#tpu.dimension_semantics<parallel>], iteration_bounds = array<i64: 1>, scalar_prefetch = 0 : i64, scratch_operands = 0 : i64, tpu.core_type = #tpu.core_type<tc>, window_params = [{transform_indices = @transform_0, window_bounds = array<i64: 32, 32>}, {pipeline_mode = #tpu.pipeline_mode<synchronous>, transform_indices = @transform_1, window_bounds = array<i64: 4, 32>}, {transform_indices = @transform_2, window_bounds = array<i64: 4, 32>}]} {
    %c0 = arith.constant 0 : index
    %c0_0 = arith.constant 0 : index
    %0 = vector.load %arg1[%c0, %c0_0] : memref<32x32xf32, #tpu.memory_space<vmem>>, vector<32x32xf32>
    %1 = arith.truncf %0 : vector<32x32xf32> to vector<32x32xbf16>
    %c0_1 = arith.constant 0 : index
    %c0_2 = arith.constant 0 : index
    %2 = vector.load %arg2[%c0_1, %c0_2] : memref<4x32xbf16, #tpu.memory_space<vmem>>, vector<4x32xbf16>
    %cst = arith.constant dense<0.000000e+00> : vector<4x32xf32>
    %3 = tpu.matmul %2, %1, %cst {dimension_numbers = #tpu.dot_dimension_numbers<[1], [1], [0], [0], [0, 0, 1, 0], [], []>} : vector<4x32xbf16>, vector<32x32xbf16>, vector<4x32xf32> -> vector<4x32xf32>
    %cst_3 = arith.constant dense<0xFF800000> : vector<32xf32>
    %4 = vector.multi_reduction <maximumf>, %3, %cst_3 [0] : vector<4x32xf32> to vector<32xf32>
    %5 = vector.shape_cast %4 : vector<32xf32> to vector<1x32xf32>
    %6 = vector.broadcast %5 : vector<1x32xf32> to vector<4x32xf32>
    %7 = arith.subf %3, %6 : vector<4x32xf32>
    %8 = math.exp %7 : vector<4x32xf32>
    %cst_4 = arith.constant dense<0.000000e+00> : vector<32xf32>
    %9 = vector.multi_reduction <add>, %8, %cst_4 [0] : vector<4x32xf32> to vector<32xf32>
    %10 = vector.shape_cast %9 : vector<32xf32> to vector<1x32xf32>
    %11 = vector.broadcast %10 : vector<1x32xf32> to vector<4x32xf32>
    %12 = arith.divf %8, %11 : vector<4x32xf32>
    %c0_5 = arith.constant 0 : index
    %c0_6 = arith.constant 0 : index
    %13 = vector.load %arg3[%c0_5, %c0_6] : memref<4x32xf32, #tpu.memory_space<vmem>>, vector<4x32xf32>
    tpu.vector_store %arg3[%c0_5, %c0_6], %12 {strides = array<i32>} : memref<4x32xf32, #tpu.memory_space<vmem>>, vector<4x32xf32>,
    return
  }
  func.func @transform_0(%arg0: i32) -> (i32, i32) {
    %c0_i32 = arith.constant 0 : i32
    %c0_i32_0 = arith.constant 0 : i32
    return %arg0, %c0_i32 : i32, i32
  }
  func.func @transform_1(%arg0: i32) -> (i32, i32) {
    %c0_i32 = arith.constant 0 : i32
    %c0_i32_0 = arith.constant 0 : i32
    %c0_i32_1 = arith.constant 0 : i32
    return %c0_i32, %c0_i32_0 : i32, i32
  }
  func.func @transform_2(%arg0: i32) -> (i32, i32) {
    %c0_i32 = arith.constant 0 : i32
    %c0_i32_0 = arith.constant 0 : i32
    return %c0_i32, %arg0 : i32, i32
  }
}

</mosaic_0001>

<bundles_post_ra>
// kernel: tpu_custom_call.1
= control target key start
LH: loop header
LB: loop body
LE: loop exit
PB: predicated region body
PF: predicated region fallthrough
CT: control target
= control target key end

     0   :  { %7 = vsyncpa [#allocation3], 0  ;;  %s245_s0 = inlined_call_operand.hbm [shape: f32[32,32], index: 0, kind: input, shape index: {}]   ;;  %s246_s1 = inlined_call_operand.hbm [shape: bf16[4,32], index: 1, kind: input, shape index: {}]   ;;  %s247_s2 = inlined_call_operand.hbm [shape: f32[4,32], index: 2, kind: output, shape index: {}]  }
   0x1   :  { %8 = vsyncpa [#allocation6], 0 }
   0x2   :  { %9 = vsyncpa [#allocation4], 0  ;;  %s14_s11 = sshll.u32 %s245_s0, 4  ;;  %s213_s12 = smov [#allocation2]   ;;  %s15_s11 = int_to_ptr.hbm [resolvable:$true] %s14_s11 }
   0x3   :  { %s16_s13 = sshll.u32 %s213_s12, 4  ;;  %s28_s16 = sshll.u32 %s246_s1, 4  ;;  %s17_s13 = int_to_ptr.vmem [resolvable:$true] %s16_s13  ;;  %s29_s16 = int_to_ptr.hbm [resolvable:$true] %s28_s16 }
   0x4   :  { %s214_s17 = smov 128   ;;  %s215_s18 = smov 8  }
   0x5   :  { %22 = dma.hbm_to_vmem [thread:$0]  %s15_s11, 512, %s17_s13, [#allocation3], %s214_s17, %s214_s17, %s215_s18  }
   0x6   :  { %s216_s19 = smov [#allocation5]  }
   0x7   :  { %s30_s20 = sshll.u32 %s216_s19, 4  ;;  %s31_s20 = int_to_ptr.vmem [resolvable:$true] %s30_s20 }
   0x8   :  { %33 = dma.hbm_to_vmem [thread:$0]  %s29_s16, 32, %s31_s20, [#allocation6]  }
   0x9   :  { %207 = dma.done.wait [#allocation3], 512  }
   0xa   :  { %208 = vsyncadd [#allocation3], 4294966784 }
   0xb   :  { %209 = dma.done.wait [#allocation6], 32  }
   0xc   :  { %210 = vsyncadd [#allocation6], 4294967264  ;;  %v45_v0 = vld [vmem:[#allocation2 + $0x10] sm:$0xff]  ;;  %v46_v1 = vld [vmem:[#allocation2 + $0x18] sm:$0xff]  ;;  %vm50_vm0 = vcmask 261120   ;;  %vm73_vm1 = vcmask 257024  }
   0xd   :  { %v48_v2 = vpack.c.bf16 %v46_v1, %v45_v0  ;;  %v43_v3 = vld [vmem:[#allocation2] sm:$0xff]  ;;  %v44_v4 = vld [vmem:[#allocation2 + $0x8] sm:$0xff]  ;;  %s217_s0 = smov [#allocation7]   ;;  %s114_s23 = sshll.u32 %s247_s2, 4  ;;  %s115_s23 = int_to_ptr.hbm [resolvable:$true] %s114_s23 }
   0xe   :  { %v47_v6 = vpack.c.bf16 %v44_v4, %v43_v3  ;;  %v49_v8 = vld [vmem:[#allocation5] sm:$0x3]  ;;  %s112_s1 = sshll.u32 %s217_s0, 4  ;;  %s113_s1 = int_to_ptr.vmem [resolvable:$true] %s112_s1 }
   0xf   :  { %v58_v5 = vsel %vm50_vm0, %v48_v2, 0 }
  0x10   :  { %66 = vmatpush.bf16.xpose.msra.mxu0 %v58_v5  ;;  %v55_v7 = vsel %vm50_vm0, %v47_v6, 0 }
  0x18   :  { %67 = vmatpush.bf16.xpose.msra.mxu0 %v55_v7 }
  0x1f   :  { %125 = vmatmul.msk.bf16.vlgmr.msra.gmra.mxu0 %vm50_vm0, %v49_v8 }
  0x9c   :  { %v69_v9 = vpop.f32.mrf.mxu0 }
  0x9d   :  { %v74_v10 = vsel %vm73_vm1, %v69_v9, -inf }
  0x9e   :  { %v75_v11 = vrot.slane %v74_v10, 4 }
  0xa0   :  { %v76_v12 = vmax.f32 %v74_v10, %v75_v11 }
  0xa2   :  { %v77_v13 = vrot.slane %v76_v12, 2 }
  0xa4   :  { %v78_v14 = vmax.f32 %v76_v12, %v77_v13  ;;  %v71_v15 = vpop.f32.mrf.mxu0 }
  0xa6   :  { %v79_v16 = vrot.slane %v78_v14, 1 }
  0xa8   :  { %v80_v17 = vmax.f32 %v78_v14, %v79_v16 }
  0xaa   :  { %v81_v18 = vsub.f32 %v69_v9, %v80_v17 }
  0xac   :  { %v82_v19 = vmul.f32 1.442695, %v81_v18 }
  0xae   :  { %131 = vpow2.f32 %v82_v19 }
  0xb4   :  { %v132_v20 = vpop.eup %131 }
  0xb5   :  { %v84_v21 = vsel %vm73_vm1, %v132_v20, 0.0 }
  0xb6   :  { %v85_v22 = vrot.slane %v84_v21, 4 }
  0xb8   :  { %v86_v23 = vadd.f32 %v85_v22, %v84_v21 }
  0xba   :  { %v87_v24 = vrot.slane %v86_v23, 2 }
  0xbc   :  { %v88_v25 = vadd.f32 %v87_v24, %v86_v23 }
  0xbe   :  { %v89_v26 = vrot.slane %v88_v25, 1 }
  0xc0   :  { %v90_v27 = vadd.f32 %v89_v26, %v88_v25 }
  0xc2   :  { %133 = vrcp.f32 %v90_v27  ;;  %v102_v31 = vand.u32 2147483648, %v90_v27  ;;  %v100_v33 = vand.u32 2147483647, %v90_v27  ;;  %vm96_vm3 = vweird.f32 %v90_v27 }
  0xc4   :  { %v103_v35 = vor.u32 1.1754944e-38, %v102_v31  ;;  %vm101_vm5 = vcmp.eq.f32.partialorder %v100_v33, 8.507059e+37 }
  0xc8   :  { %v134_v28 = vpop.eup %133 }
  0xc9   :  { %v92_v29 = vmul.f32 %v134_v28, %v90_v27  ;;  %vm97_vm2 = vweird.f32 %v134_v28 }
  0xca   :  { %vm98_vm4 = vmor %vm96_vm3, %vm97_vm2 }
  0xcb   :  { %v93_v30 = vsub.f32 1.0, %v92_v29 }
  0xcd   :  { %v94_v32 = vmul.f32 %v134_v28, %v93_v30 }
  0xcf   :  { %v95_v34 = vadd.f32 %v134_v28, %v94_v32 }
  0xd1   :  { %v99_v36 = vsel %vm98_vm4, %v134_v28, %v95_v34 }
  0xd2   :  { %v104_v37 = vsel %vm101_vm5, %v103_v35, %v99_v36 }
  0xd3   :  { %v105_v38 = vmul.f32 %v132_v20, %v104_v37 }
  0xd5   :  { %106 = vst.msk [vmem:[#allocation7] sm:$0xf] %vm73_vm1, %v105_v38 }
  0xd6   :  { %117 = dma.vmem_to_hbm [thread:$0]  %s113_s1, 64, %s115_s23, [#allocation4]  }
  0xd7   :  { %211 = dma.done.wait [#allocation4], 64  }
  0xd8   :  { %212 = vsyncadd [#allocation4], 4294967232 }
  0xd9   :  { %122 = vsyncpa [#allocation3], 1 }
  0xda   :  { %123 = vsyncpa [#allocation6], 1 }
  0xdb   :  { %124 = vsyncpa [#allocation4], 1 }

</bundles_post_ra>
